<compile_context>
chip_gen: v7x
topology: tpu7x:2x2x1
jax: 0.10.0
libtpu: 0.0.40
codegen_flags: <defaults>
</compile_context>

<pallas_src>
import jax
import jax.numpy as jnp
from jax.experimental import pallas as pl
from jax.experimental.pallas import tpu as pltpu


def _sigmoid_kernel(x_ref, o_ref):
    # sigmoid(x) = 1 / (1 + exp(-x)); exp routes to the EUP slot, rest is cheap VPU work.
    o_ref[...] = jax.nn.sigmoid(x_ref[...])


@jax.jit
def sigmoid_pallas(x: jax.Array) -> jax.Array:
    """Elementwise sigmoid over an NCHW [1, C, 1, 1] (or any) input."""
    orig_shape = x.shape
    n = x.size

    # Pure-metadata view: flatten to a single contiguous row.  Block == full array,
    # so the (8,128) divisibility constraint does not apply.  No pad, no slice.
    x2d = x.reshape(1, n)

    out2d = pl.pallas_call(
        _sigmoid_kernel,
        out_shape=jax.ShapeDtypeStruct(x2d.shape, x2d.dtype),
        # Single full-array block resident in VMEM; no grid, no pipeline scaffolding.
        in_specs=[pl.BlockSpec(memory_space=pltpu.MemorySpace.VMEM)],
        out_specs=pl.BlockSpec(memory_space=pltpu.MemorySpace.VMEM),
    )(x2d)

    # Restore the original NCHW shape (metadata only).
    return out2d.reshape(orig_shape)


if __name__ == "__main__":
    key = jax.random.PRNGKey(0)
    # Shape implied by the module's forward: [1, 1200, 1, 1]
    x = jax.random.normal(key, (1, 1200, 1, 1), dtype=jnp.float32)

    y = sigmoid_pallas(x)
    jax.block_until_ready(y)

    # Sanity check against reference.
    y_ref = jax.nn.sigmoid(x)
    assert y.shape == x.shape
    assert jnp.allclose(y, y_ref, atol=1e-6, rtol=1e-6)

    print("KERNEL_OK")
</pallas_src>

<mosaic_0001>
module attributes {stable_mosaic.version = 11 : i64} {
  func.func @_sigmoid_kernel(%arg0: memref<1x1200xf32, #tpu.memory_space<vmem>>, %arg1: memref<1x1200xf32, #tpu.memory_space<vmem>>) attributes {dimension_semantics = [], scalar_prefetch = 0 : i64, scratch_operands = 0 : i64, tpu.core_type = #tpu.core_type<tc>} {
    %c0 = arith.constant 0 : index
    %c0_0 = arith.constant 0 : index
    %0 = vector.load %arg0[%c0, %c0_0] : memref<1x1200xf32, #tpu.memory_space<vmem>>, vector<1x1200xf32>
    %1 = arith.negf %0 : vector<1x1200xf32>
    %2 = math.exp %1 : vector<1x1200xf32>
    %cst = arith.constant 1.000000e+00 : f32
    %3 = vector.broadcast %cst : f32 to vector<1x1200xf32>
    %4 = arith.addf %3, %2 : vector<1x1200xf32>
    %5 = arith.divf %3, %4 : vector<1x1200xf32>
    %c0_1 = arith.constant 0 : index
    %c0_2 = arith.constant 0 : index
    %6 = vector.load %arg1[%c0_1, %c0_2] : memref<1x1200xf32, #tpu.memory_space<vmem>>, vector<1x1200xf32>
    tpu.vector_store %arg1[%c0_1, %c0_2], %5 {strides = array<i32>} : memref<1x1200xf32, #tpu.memory_space<vmem>>, vector<1x1200xf32>,
    return
  }
}

</mosaic_0001>

<bundles_post_ra>
// kernel: sigmoid_pallas.1
= control target key start
LH: loop header
LB: loop body
LE: loop exit
PB: predicated region body
PF: predicated region fallthrough
CT: control target
= control target key end

     0   :  { %6 = vsyncpa [#allocation3], 0  ;;  %s152_s0 = inlined_call_operand.hbm [shape: f32[1,1200], index: 0, kind: input, shape index: {}]   ;;  %s153_s1 = inlined_call_operand.hbm [shape: f32[1,1200], index: 1, kind: output, shape index: {}]  }
   0x1   :  { %7 = vsyncpa [#allocation4], 0  ;;  %s116_s6 = smov [#allocation2]   ;;  %s68_s10 = scalar_lea.hbm %s152_s0, 160 }
   0x2   :  { %s14_s7 = sshll.u32 %s116_s6, 4  ;;  %p69_p0 = scmp.ne.s32.totalorder %s152_s0, %s68_s10  ;;  %s15_s7 = int_to_ptr.vmem [resolvable:$true] %s14_s7 }
   0x3   :  { %p72_p1 = scmp.lt.u32.totalorder %s68_s10, %s152_s0 }
   0x5   :  { %p74_p2 = pnand %p72_p1, %p69_p0 }
   0x7   :  { %77 = shalt.err (!%p74_p2)
}
   0x8   :  { %s78_s15 = scalar_lea.vmem %s15_s7, 160  ;;  %p83_p4 = scmp.lt.s32.totalorder %s15_s7, %s15_s7 }
   0x9   :  { %p79_p3 = scmp.ne.s32.totalorder %s15_s7, %s78_s15  ;;  %p84_p5 = scmp.lt.s32.totalorder %s78_s15, %s78_s15 }
   0xb   :  { %p85_p6 = por %p84_p5, %p83_p4 }
   0xd   :  { %p86_p7 = pnand %p85_p6, %p79_p3 }
   0xf   :  { %89 = shalt.err (!%p86_p7)
}
  0x10   :  { %17 = dma.hbm_to_vmem [thread:$0]  %s152_s0, 160, %s15_s7, [#allocation3]  }
  0x11   :  { %112 = dma.done.wait [#allocation3], 160  }
  0x12   :  { %113 = vsyncadd [#allocation3], 4294967136  ;;  %v21_v0 = vld [vmem:[#allocation2] sm:$0xff]  ;;  %v22_v1 = vld [vmem:[#allocation2 + $0x8] sm:$0x3]  ;;  %v36_v8 = vlaneseq  ;;  %s117_s18 = smov [#allocation5]  }
  0x13   :  { %v56_v2 = vmul.f32 -1.442695, %v21_v0  ;;  %v57_v3 = vmul.f32 -1.442695, %v22_v1  ;;  %s47_s19 = sshll.u32 %s117_s18, 4  ;;  %s48_s19 = int_to_ptr.vmem [resolvable:$true] %s47_s19 }
  0x14   :  { %vm38_vm0 = vcmp.lt.s32.totalorder %v36_v8, 176  ;;  %s90_s0 = scalar_lea.vmem %s48_s19, 160  ;;  %p95_p9 = scmp.lt.s32.totalorder %s48_s19, %s48_s19 }
  0x15   :  { %60 = vpow2.f32 %v56_v2  ;;  %p91_p8 = scmp.ne.s32.totalorder %s48_s19, %s90_s0  ;;  %p96_p10 = scmp.lt.s32.totalorder %s90_s0, %s90_s0 }
  0x16   :  { %62 = vpow2.f32 %v57_v3 }
  0x17   :  { %p97_p11 = por %p96_p10, %p95_p9 }
  0x19   :  { %p98_p12 = pnand %p97_p11, %p91_p8 }
  0x1f   :  { %v61_v4 = vpop.eup %60 }
  0x20   :  { %v63_v5 = vpop.eup %62  ;;  %v29_v6 = vadd.f32 1.0, %v61_v4 }
  0x21   :  { %v30_v7 = vadd.f32 1.0, %v63_v5 }
  0x22   :  { %64 = vrcp.f32 %v29_v6 }
  0x23   :  { %66 = vrcp.f32 %v30_v7 }
  0x2c   :  { %v65_v9 = vpop.eup %64 }
  0x2d   :  { %v67_v10 = vpop.eup %66  ;;  %35 = vst [vmem:[#allocation5] sm:$0xff] %v65_v9 }
  0x2e   :  { %40 = vst.msk [vmem:[#allocation5 + $0x8] sm:$0x3] %vm38_vm0, %v67_v10 }
  0x2f   :  { %101 = shalt.err (!%p98_p12)
}
  0x30   :  { %s102_s22 = scalar_lea.hbm %s153_s1, 160 }
  0x31   :  { %p103_p13 = scmp.ne.s32.totalorder %s153_s1, %s102_s22  ;;  %p106_p0 = scmp.lt.u32.totalorder %s102_s22, %s153_s1 }
  0x33   :  { %p108_p1 = pnand %p106_p0, %p103_p13 }
  0x35   :  { %111 = shalt.err (!%p108_p1)
}
  0x36   :  { %50 = dma.vmem_to_hbm [thread:$0]  %s48_s19, 160, %s153_s1, [#allocation4]  }
  0x37   :  { %114 = dma.done.wait [#allocation4], 160  }
  0x38   :  { %115 = vsyncadd [#allocation4], 4294967136 }
  0x39   :  { %54 = vsyncpa [#allocation3], 1 }
  0x3a   :  { %55 = vsyncpa [#allocation4], 1 }

</bundles_post_ra>
